<compile_context>
chip_gen: v6e
topology: v6e:2x2x1
jax: 0.10.0
libtpu: 0.0.40
codegen_flags: <defaults>
</compile_context>

<pallas_src>
import jax
import jax.numpy as jnp
from jax.experimental import pallas as pl
from jax.experimental.pallas import tpu as pltpu


def _identity_kernel(x_ref, o_ref):
    # Straight full-tile copy; lane-dense tiles -> unmasked vst on all chips.
    o_ref[...] = x_ref[...]


def _round_up(a, b):
    return ((a + b - 1) // b) * b


def _vmem_capacity_bytes():
    """Per-core VMEM capacity; conservative default if the query fails."""
    try:
        return int(pltpu.get_tpu_info().vmem_capacity_bytes)
    except Exception:
        return 64 << 20  # assume v7x-sized VMEM (the smallest generation)


def mean_encoder_forward(x, *, min_kernel_bytes=1 << 20):
    """Identity forward pass of MeanEncoder.

    Tensors smaller than `min_kernel_bytes` (default 1 MiB) are returned
    as-is: the op is an identity, so a kernel launch is pure overhead there.
    Larger tensors are streamed through a tiled Pallas copy kernel.
    """
    if x.size == 0:
        return x

    dtype = x.dtype
    n = int(x.size)
    itemsize = jnp.dtype(dtype).itemsize
    total_bytes = n * itemsize

    # Fast path: identity, nothing to compute, skip the kernel entirely.
    if total_bytes < min_kernel_bytes:
        return x

    orig_shape = x.shape

    # Generation-aware sizing (v5e/v6e: 128 MiB VMEM, v7x: 64 MiB per TC).
    vmem_cap = _vmem_capacity_bytes()
    if vmem_cap >= (100 << 20):        # v5e / v6e
        target_tile_bytes = 16 << 20
        vmem_limit_cap = 64 << 20
    else:                              # v7x
        target_tile_bytes = 8 << 20
        vmem_limit_cap = 40 << 20

    cost = pl.CostEstimate(flops=0, transcendentals=0,
                           bytes_accessed=2 * total_bytes)

    if n % 128 != 0:
        # Rare: no lane-dense 2-D reshape exists without padding.  Copy the
        # whole array as a single full-dims block (always legal) when small
        # enough; otherwise the identity result is simply x.
        if total_bytes > (8 << 20):
            # TODO(synk): huge tensors whose element count is not a multiple
            # of 128 -- identity, a kernel would only add HBM traffic.
            return x
        x2d = x.reshape(1, n)
        out2d = pl.pallas_call(
            _identity_kernel,
            out_shape=jax.ShapeDtypeStruct((1, n), dtype),
            compiler_params=pltpu.CompilerParams(
                vmem_limit_bytes=int(min(vmem_limit_cap,
                                         max(16 << 20,
                                             4 * total_bytes + (2 << 20))))),
            cost_estimate=cost,
        )(x2d)
        return out2d.reshape(orig_shape)

    # Lane-dense slab: widest lane count in {1024, 512, 256, 128} dividing n,
    # so no padding and no output slice are ever needed.
    lanes = 128
    for cand in (1024, 512, 256):
        if n % cand == 0:
            lanes = cand
            break
    rows = n // lanes

    # Native sublane packing for the dtype: 8 (f32) / 16 (bf16) / 32 (int8).
    sub = max(8, 32 // max(1, itemsize))

    # Largest tile (row count a multiple of `sub`) within the per-buffer target.
    max_tile_rows = max(sub, (target_tile_bytes // (lanes * itemsize)) // sub * sub)
    tile_rows = rows if rows <= max_tile_rows else max_tile_rows

    # v7x megacore: ensure >= 2 grid blocks for arrays > 2 MiB so
    # dimension_semantics=("parallel",) can shard across both TensorCores.
    if total_bytes > (2 << 20) and rows >= 2 * sub:
        tile_rows = min(tile_rows, _round_up(pl.cdiv(rows, 2), sub))

    num_blocks = pl.cdiv(rows, tile_rows)   # ragged tail handled by OOB masking
    tile_bytes = tile_rows * lanes * itemsize
    # 2x double-buffered input + 2x output + headroom, within the per-gen cap.
    vmem_limit = min(vmem_limit_cap, max(16 << 20, 4 * tile_bytes + (2 << 20)))

    x2d = x.reshape(rows, lanes)            # view-level reshape, no extra pass

    out2d = pl.pallas_call(
        _identity_kernel,
        out_shape=jax.ShapeDtypeStruct((rows, lanes), dtype),
        grid_spec=pltpu.PrefetchScalarGridSpec(
            num_scalar_prefetch=0,
            grid=(num_blocks,),
            in_specs=[pl.BlockSpec((tile_rows, lanes), lambda i: (i, 0))],
            out_specs=pl.BlockSpec((tile_rows, lanes), lambda i: (i, 0)),
        ),
        compiler_params=pltpu.CompilerParams(
            dimension_semantics=("parallel",),
            vmem_limit_bytes=int(vmem_limit),
        ),
        cost_estimate=cost,
    )(x2d)

    return out2d.reshape(orig_shape)


class MeanEncoder:
    """Identity function (Pallas-backed). Mirrors the PyTorch module."""

    def __init__(self, shape):
        self.shape = shape  # no parameters

    def __call__(self, x, **kwargs):
        return mean_encoder_forward(x, **kwargs)


if __name__ == "__main__":
    key = jax.random.PRNGKey(0)
    k_small, k_med = jax.random.split(key)

    # Small NCHW input (8 KiB): batch=2, channels=4, spatial=16x16.
    x_small = jax.random.normal(k_small, (2, 4, 16, 16), dtype=jnp.float32)
    enc = MeanEncoder(shape=x_small.shape[1:])

    # 1) Default path: below the 1 MiB threshold the identity short-circuits
    #    (no kernel launch, no HBM traffic).
    y_fast = jax.block_until_ready(enc(x_small))
    assert y_fast.shape == x_small.shape and y_fast.dtype == x_small.dtype
    assert bool(jnp.all(y_fast == x_small))

    # 2) Forced kernel path on the same small input: exercises the Pallas
    #    lowering (single full-dims lane-dense block).
    y_kern = jax.block_until_ready(mean_encoder_forward(x_small, min_kernel_bytes=0))
    assert y_kern.shape == x_small.shape and y_kern.dtype == x_small.dtype
    assert bool(jnp.all(y_kern == x_small))

    # 3) Medium input (2.5 MiB): takes the kernel path by default and
    #    exercises the multi-block (>= 2 blocks) parallel grid.
    x_med = jax.random.normal(k_med, (640, 1024), dtype=jnp.float32)
    y_med = jax.block_until_ready(enc(x_med))
    assert y_med.shape == x_med.shape and y_med.dtype == x_med.dtype
    assert bool(jnp.all(y_med == x_med))

    print("KERNEL_OK")
</pallas_src>

<mosaic_0001>
module attributes {stable_mosaic.version = 11 : i64} {
  func.func @_identity_kernel(%arg0: i32, %arg1: memref<2x1024xf32, #tpu.memory_space<vmem>>, %arg2: memref<2x1024xf32, #tpu.memory_space<vmem>>) attributes {dimension_semantics = [#tpu.dimension_semantics<parallel>], iteration_bounds = array<i64: 1>, scalar_prefetch = 0 : i64, scratch_operands = 0 : i64, tpu.core_type = #tpu.core_type<tc>, window_params = [{transform_indices = @transform_0, window_bounds = array<i64: 2, 1024>}, {transform_indices = @transform_1, window_bounds = array<i64: 2, 1024>}]} {
    %c0 = arith.constant 0 : index
    %c0_0 = arith.constant 0 : index
    %0 = vector.load %arg1[%c0, %c0_0] : memref<2x1024xf32, #tpu.memory_space<vmem>>, vector<2x1024xf32>
    %c0_1 = arith.constant 0 : index
    %c0_2 = arith.constant 0 : index
    %1 = vector.load %arg2[%c0_1, %c0_2] : memref<2x1024xf32, #tpu.memory_space<vmem>>, vector<2x1024xf32>
    tpu.vector_store %arg2[%c0_1, %c0_2], %0 {strides = array<i32>} : memref<2x1024xf32, #tpu.memory_space<vmem>>, vector<2x1024xf32>,
    return
  }
  func.func @transform_0(%arg0: i32) -> (i32, i32) {
    %c0_i32 = arith.constant 0 : i32
    %c0_i32_0 = arith.constant 0 : i32
    return %arg0, %c0_i32 : i32, i32
  }
  func.func @transform_1(%arg0: i32) -> (i32, i32) {
    %c0_i32 = arith.constant 0 : i32
    %c0_i32_0 = arith.constant 0 : i32
    return %arg0, %c0_i32 : i32, i32
  }
}

</mosaic_0001>

<bundles_post_ra>
// kernel: tpu_custom_call.1
= control target key start
LH: loop header
LB: loop body
LE: loop exit
PB: predicated region body
PF: predicated region fallthrough
CT: control target
= control target key end

     0   :  { %6 = vsyncpa [#allocation3], 0  ;;  %s104_s0 = inlined_call_operand.hbm [shape: f32[2,1024], index: 0, kind: input, shape index: {}]   ;;  %s105_s1 = inlined_call_operand.hbm [shape: f32[2,1024], index: 1, kind: output, shape index: {}]  }
   0x1   :  { %7 = vsyncpa [#allocation4], 0  ;;  %s86_s6 = smov [#allocation2]  }
   0x2   :  { %s14_s7 = sshll.u32 %s86_s6, 4  ;;  %s15_s7 = int_to_ptr.vmem [resolvable:$true] %s14_s7 }
   0x3   :  { %s50_s8 = scalar_lea.vmem %s15_s7, 256  ;;  %p55_p1 = scmp.lt.s32.totalorder %s15_s7, %s15_s7 }
   0x4   :  { %p51_p0 = scmp.ne.s32.totalorder %s15_s7, %s50_s8  ;;  %p56_p2 = scmp.lt.s32.totalorder %s50_s8, %s50_s8 }
   0x6   :  { %p57_p3 = por %p56_p2, %p55_p1 }
   0x8   :  { %p58_p4 = pnand %p57_p3, %p51_p0 }
   0xa   :  { %61 = shalt.err (!%p58_p4)
}
   0xb   :  { %17 = dma.hbm_to_vmem [thread:$0]  %s104_s0, 256, %s15_s7, [#allocation3]  }
   0xc   :  { %82 = dma.done.wait [#allocation3], 256  }
   0xd   :  { %83 = vsyncadd [#allocation3], 4294967040  ;;  %s87_s11 = smov [#allocation5]   ;;  %v21_v0 = vld [vmem:[#allocation2] sm:$0xff]  ;;  %v22_v1 = vld [vmem:[#allocation2 + $0x8] sm:$0xff] }
   0xe   :  { %s31_s12 = sshll.u32 %s87_s11, 4  ;;  %23 = vst [vmem:[#allocation5] sm:$0xff] %v21_v0  ;;  %24 = vst [vmem:[#allocation5 + $0x8] sm:$0xff] %v22_v1  ;;  %s32_s12 = int_to_ptr.vmem [resolvable:$true] %s31_s12 }
   0xf   :  { %s62_s13 = scalar_lea.vmem %s32_s12, 256  ;;  %p67_p6 = scmp.lt.s32.totalorder %s32_s12, %s32_s12 }
  0x10   :  { %p63_p5 = scmp.ne.s32.totalorder %s32_s12, %s62_s13  ;;  %p68_p7 = scmp.lt.s32.totalorder %s62_s13, %s62_s13 }
  0x12   :  { %p69_p8 = por %p68_p7, %p67_p6 }
  0x14   :  { %p70_p9 = pnand %p69_p8, %p63_p5 }
  0x16   :  { %73 = shalt.err (!%p70_p9)
}
  0x17   :  { %34 = dma.vmem_to_hbm [thread:$0]  %s32_s12, 256, %s105_s1, [#allocation4]  }
  0x18   :  { %84 = dma.done.wait [#allocation4], 256  }
  0x19   :  { %85 = vsyncadd [#allocation4], 4294967040 }
  0x1a   :  { %38 = vsyncpa [#allocation3], 1 }
  0x1b   :  { %39 = vsyncpa [#allocation4], 1 }

</bundles_post_ra>
